<compile_context>
chip_gen: v5e
topology: v5e:2x2
jax: 0.10.0
libtpu: 0.0.40
codegen_flags: <defaults>
</compile_context>

<pallas_src>
import jax
import jax.numpy as jnp
from jax import lax
from jax.experimental import pallas as pl
from jax.experimental.pallas import tpu as pltpu


def _round_up(n, m):
    return ((n + m - 1) // m) * m


def mlp_kernel(x_ref, w1_ref, b1_ref, w2_ref, b2_ref, w3_ref, b3_ref, o_ref):
    # In-kernel cast of the x tile to the MXU operand dtype (no-op for f32).
    x = x_ref[...].astype(w1_ref.dtype)

    # Layer 1: h1[m, n] = sum_k W1[m, k] * x[n, k]  (== (x @ W1^T)^T).
    # Native A @ B^T MXU pattern; f32 accumulation. Batch lands on lanes.
    nt_dims = (((1,), (1,)), ((), ()))
    h1 = lax.dot_general(w1_ref[...], x, nt_dims,
                         preferred_element_type=jnp.float32)
    h1 = jnp.maximum(h1 + b1_ref[...], 0.0)                  # (64, TILE_B) f32

    # Layer 2: (32, 64) @ (64, TILE_B) -> (32, TILE_B), f32 accumulation.
    h2 = jnp.dot(w2_ref[...], h1.astype(w2_ref.dtype),
                 preferred_element_type=jnp.float32)
    h2 = jnp.maximum(h2 + b2_ref[...], 0.0)                  # (32, TILE_B) f32

    # Layer 3 (32 -> 1) on VPU + XLU: weighted sublane reduction -> lane-dense
    # (1, TILE_B) row, feeding unmasked vector stores.
    out = jnp.sum(h2 * w3_ref[...], axis=0, keepdims=True) + b3_ref[...]
    o_ref[...] = out.astype(o_ref.dtype)


def mlp_forward(x, params, *, mxu_dtype=jnp.float32, max_tile_b=8192):
    """x: [B, D]. params in PyTorch nn.Linear layout:
       W1 [64, D], b1 [64], W2 [32, 64], b2 [32], W3 [1, 32], b3 [1].
       Returns [B, 1] float32.

       mxu_dtype: dtype of the matmul operands (weights at rest + in-kernel
       cast of the x tile / h1). float32 = exact module semantics; bfloat16
       recommended on v5e (bf16-only MXU), modest error (~1e-2 relative)."""
    B, D = x.shape
    W1, b1 = params["W1"], params["b1"]
    W2, b2 = params["W2"], params["b2"]
    W3, b3 = params["W3"], params["b3"]
    H1, H2 = W1.shape[0], W2.shape[0]

    LANE = 128

    # --- Tile sizing -------------------------------------------------------
    # VMEM per row of a tile (bytes): x double-buffer with the D dim
    # lane-padded to 128, output double-buffer, plus f32 h1/h2 temporaries
    # (x2 headroom for compiler copies). Cap tile_b so total stays well under
    # the 32 MiB scoped-VMEM default on every generation (incl. v7x's 64 MiB).
    d_pad = _round_up(D, LANE)
    per_row_vmem = (2 * d_pad * x.dtype.itemsize            # x, double-buffered
                    + 2 * 4                                  # output, double-buffered
                    + (H1 + H2) * 4 * 2)                     # h1/h2 f32 (+headroom)
    vmem_budget = 24 << 20
    vmem_cap_rows = max(LANE, (vmem_budget // per_row_vmem) // LANE * LANE)
    max_tile = min(max_tile_b, vmem_cap_rows)

    # Choose tile count first (bounds padding waste to < 128 rows per tile),
    # force >= 2 tiles when there's enough work so both v7x TCs get a share,
    # and keep tile_b a multiple of 128 (lane-dense output; bf16-safe sublanes).
    n_tiles = pl.cdiv(B, max_tile)
    if B >= 2 * LANE:
        n_tiles = max(n_tiles, 2)
    tile_b = _round_up(pl.cdiv(B, n_tiles), LANE)
    n_tiles = pl.cdiv(B, tile_b)
    padded_B = n_tiles * tile_b

    xp = x if padded_B == B else jnp.pad(x, ((0, padded_B - B), (0, 0)))

    # --- Operands ----------------------------------------------------------
    # x is streamed in its at-rest dtype (no wrapper-side cast -> no extra HBM
    # pass). Only the tiny VMEM-resident weights are cast to the MXU dtype.
    w1c = W1.astype(mxu_dtype)                               # (H1, D)
    w2c = W2.astype(mxu_dtype)                               # (H2, H1)
    b1c = b1.reshape(H1, 1).astype(jnp.float32)
    b2c = b2.reshape(H2, 1).astype(jnp.float32)
    w3c = W3.reshape(H2, 1).astype(jnp.float32)              # column of W3
    b3c = b3.reshape(1, 1).astype(jnp.float32)

    def const(shape):
        # Constant block index -> weights stay VMEM-resident across grid steps.
        return pl.BlockSpec(shape, lambda i: (0, 0))

    flops = 2 * B * (D * H1 + H1 * H2 + H2)
    bytes_accessed = (
        xp.size * xp.dtype.itemsize + padded_B * 4
        + w1c.size * w1c.dtype.itemsize + w2c.size * w2c.dtype.itemsize
        + (b1c.size + b2c.size + w3c.size + b3c.size) * 4)

    out_row = pl.pallas_call(
        mlp_kernel,
        out_shape=jax.ShapeDtypeStruct((1, padded_B), jnp.float32),
        grid=(n_tiles,),
        in_specs=[
            pl.BlockSpec((tile_b, D), lambda i: (i, 0)),     # streamed x tiles
            const(w1c.shape), const(b1c.shape),
            const(w2c.shape), const(b2c.shape),
            const(w3c.shape), const(b3c.shape),
        ],
        # Lane-dense output: batch on the lane axis of store + HBM writeback.
        out_specs=pl.BlockSpec((1, tile_b), lambda i: (0, i)),
        compiler_params=pltpu.CompilerParams(
            dimension_semantics=("parallel",),
        ),
        cost_estimate=pl.CostEstimate(
            flops=flops, transcendentals=0, bytes_accessed=bytes_accessed),
    )(xp, w1c, b1c, w2c, b2c, w3c, b3c)

    return out_row[0, :B].reshape(B, 1)


def init_params(key, input_dim):
    """Deterministic init mimicking nn.Linear bounds; PyTorch layout:
    W [out, in], b [out]."""
    ks = jax.random.split(key, 6)

    def lin(kw, kb, fan_in, fan_out):
        bound = 1.0 / jnp.sqrt(jnp.float32(fan_in))
        w = jax.random.uniform(kw, (fan_out, fan_in), jnp.float32, -bound, bound)
        b = jax.random.uniform(kb, (fan_out,), jnp.float32, -bound, bound)
        return w, b

    W1, b1 = lin(ks[0], ks[1], input_dim, 64)
    W2, b2 = lin(ks[2], ks[3], 64, 32)
    W3, b3 = lin(ks[4], ks[5], 32, 1)
    return dict(W1=W1, b1=b1, W2=W2, b2=b2, W3=W3, b3=b3)


def ref_forward(x, p):
    h1 = jnp.maximum(x @ p["W1"].T + p["b1"], 0.0)
    h2 = jnp.maximum(h1 @ p["W2"].T + p["b2"], 0.0)
    return h2 @ p["W3"].T + p["b3"]


if __name__ == "__main__":
    key = jax.random.PRNGKey(0)
    kx, kp, kx2 = jax.random.split(key, 3)

    D = 32
    params = init_params(kp, D)

    # Small shape consistent with MLP(input_dim=32): exact f32 semantics.
    B = 8
    x = jax.random.normal(kx, (B, D), jnp.float32)
    out = jax.block_until_ready(mlp_forward(x, params))
    ref = ref_forward(x, params)
    assert out.shape == (B, 1)
    assert jnp.allclose(out, ref, atol=1e-5, rtol=1e-5)

    # Multi-tile path (exercises n_tiles >= 2, padding slice-off) + the bf16
    # MXU-operand option (f32 accumulation; loose tolerance).
    B2 = 300
    x2 = jax.random.normal(kx2, (B2, D), jnp.float32)
    ref2 = ref_forward(x2, params)

    out2 = jax.block_until_ready(mlp_forward(x2, params))
    assert out2.shape == (B2, 1)
    assert jnp.allclose(out2, ref2, atol=1e-5, rtol=1e-5)

    out2_bf16 = jax.block_until_ready(
        mlp_forward(x2, params, mxu_dtype=jnp.bfloat16))
    assert out2_bf16.shape == (B2, 1)
    assert jnp.allclose(out2_bf16, ref2, atol=1e-1, rtol=1e-1)

    print("KERNEL_OK")
</pallas_src>

<mosaic_0001>
module attributes {stable_mosaic.version = 11 : i64} {
  func.func @mlp_kernel(%arg0: i32, %arg1: memref<128x32xf32, #tpu.memory_space<vmem>>, %arg2: memref<64x32xf32, #tpu.memory_space<vmem>>, %arg3: memref<64x1xf32, #tpu.memory_space<vmem>>, %arg4: memref<32x64xf32, #tpu.memory_space<vmem>>, %arg5: memref<32x1xf32, #tpu.memory_space<vmem>>, %arg6: memref<32x1xf32, #tpu.memory_space<vmem>>, %arg7: memref<1x1xf32, #tpu.memory_space<vmem>>, %arg8: memref<1x128xf32, #tpu.memory_space<vmem>>) attributes {dimension_semantics = [#tpu.dimension_semantics<parallel>], iteration_bounds = array<i64: 1>, scalar_prefetch = 0 : i64, scratch_operands = 0 : i64, tpu.core_type = #tpu.core_type<tc>, window_params = [{transform_indices = @transform_0, window_bounds = array<i64: 128, 32>}, {pipeline_mode = #tpu.pipeline_mode<synchronous>, transform_indices = @transform_1, window_bounds = array<i64: 64, 32>}, {pipeline_mode = #tpu.pipeline_mode<synchronous>, transform_indices = @transform_2, window_bounds = array<i64: 64, 1>}, {pipeline_mode = #tpu.pipeline_mode<synchronous>, transform_indices = @transform_3, window_bounds = array<i64: 32, 64>}, {pipeline_mode = #tpu.pipeline_mode<synchronous>, transform_indices = @transform_4, window_bounds = array<i64: 32, 1>}, {pipeline_mode = #tpu.pipeline_mode<synchronous>, transform_indices = @transform_5, window_bounds = array<i64: 32, 1>}, {pipeline_mode = #tpu.pipeline_mode<synchronous>, transform_indices = @transform_6, window_bounds = array<i64: 1, 1>}, {transform_indices = @transform_7, window_bounds = array<i64: 1, 128>}]} {
    %c0 = arith.constant 0 : index
    %c0_0 = arith.constant 0 : index
    %0 = vector.load %arg1[%c0, %c0_0] : memref<128x32xf32, #tpu.memory_space<vmem>>, vector<128x32xf32>
    %c0_1 = arith.constant 0 : index
    %c0_2 = arith.constant 0 : index
    %1 = vector.load %arg2[%c0_1, %c0_2] : memref<64x32xf32, #tpu.memory_space<vmem>>, vector<64x32xf32>
    %cst = arith.constant dense<0.000000e+00> : vector<64x128xf32>
    %2 = tpu.matmul %1, %0, %cst {dimension_numbers = #tpu.dot_dimension_numbers<[1], [1], [0], [0], [0, 0, 1, 0], [], []>} : vector<64x32xf32>, vector<128x32xf32>, vector<64x128xf32> -> vector<64x128xf32>
    %c0_3 = arith.constant 0 : index
    %c0_4 = arith.constant 0 : index
    %3 = vector.load %arg3[%c0_3, %c0_4] : memref<64x1xf32, #tpu.memory_space<vmem>>, vector<64x1xf32>
    %4 = vector.broadcast %3 : vector<64x1xf32> to vector<64x128xf32>
    %5 = arith.addf %2, %4 : vector<64x128xf32>
    %cst_5 = arith.constant 0.000000e+00 : f32
    %6 = vector.broadcast %cst_5 : f32 to vector<64x128xf32>
    %7 = arith.maximumf %5, %6 : vector<64x128xf32>
    %c0_6 = arith.constant 0 : index
    %c0_7 = arith.constant 0 : index
    %8 = vector.load %arg4[%c0_6, %c0_7] : memref<32x64xf32, #tpu.memory_space<vmem>>, vector<32x64xf32>
    %cst_8 = arith.constant dense<0.000000e+00> : vector<32x128xf32>
    %9 = tpu.matmul %8, %7, %cst_8 {dimension_numbers = #tpu.dot_dimension_numbers<[1], [0], [0], [1], [0, 0, 1, 1], [], []>} : vector<32x64xf32>, vector<64x128xf32>, vector<32x128xf32> -> vector<32x128xf32>
    %c0_9 = arith.constant 0 : index
    %c0_10 = arith.constant 0 : index
    %10 = vector.load %arg5[%c0_9, %c0_10] : memref<32x1xf32, #tpu.memory_space<vmem>>, vector<32x1xf32>
    %11 = vector.broadcast %10 : vector<32x1xf32> to vector<32x128xf32>
    %12 = arith.addf %9, %11 : vector<32x128xf32>
    %cst_11 = arith.constant 0.000000e+00 : f32
    %13 = vector.broadcast %cst_11 : f32 to vector<32x128xf32>
    %14 = arith.maximumf %12, %13 : vector<32x128xf32>
    %c0_12 = arith.constant 0 : index
    %c0_13 = arith.constant 0 : index
    %15 = vector.load %arg6[%c0_12, %c0_13] : memref<32x1xf32, #tpu.memory_space<vmem>>, vector<32x1xf32>
    %16 = vector.broadcast %15 : vector<32x1xf32> to vector<32x128xf32>
    %17 = arith.mulf %14, %16 : vector<32x128xf32>
    %cst_14 = arith.constant dense<0.000000e+00> : vector<128xf32>
    %18 = vector.multi_reduction <add>, %17, %cst_14 [0] : vector<32x128xf32> to vector<128xf32>
    %19 = vector.shape_cast %18 : vector<128xf32> to vector<1x128xf32>
    %c0_15 = arith.constant 0 : index
    %c0_16 = arith.constant 0 : index
    %20 = vector.load %arg7[%c0_15, %c0_16] : memref<1x1xf32, #tpu.memory_space<vmem>>, vector<1x1xf32>
    %21 = vector.broadcast %20 : vector<1x1xf32> to vector<1x128xf32>
    %22 = arith.addf %19, %21 : vector<1x128xf32>
    %c0_17 = arith.constant 0 : index
    %c0_18 = arith.constant 0 : index
    %23 = vector.load %arg8[%c0_17, %c0_18] : memref<1x128xf32, #tpu.memory_space<vmem>>, vector<1x128xf32>
    tpu.vector_store %arg8[%c0_17, %c0_18], %22 {strides = array<i32>} : memref<1x128xf32, #tpu.memory_space<vmem>>, vector<1x128xf32>,
    return
  }
  func.func @transform_0(%arg0: i32) -> (i32, i32) {
    %c0_i32 = arith.constant 0 : i32
    %c0_i32_0 = arith.constant 0 : i32
    return %arg0, %c0_i32 : i32, i32
  }
  func.func @transform_1(%arg0: i32) -> (i32, i32) {
    %c0_i32 = arith.constant 0 : i32
    %c0_i32_0 = arith.constant 0 : i32
    %c0_i32_1 = arith.constant 0 : i32
    return %c0_i32, %c0_i32_0 : i32, i32
  }
  func.func @transform_2(%arg0: i32) -> (i32, i32) {
    %c0_i32 = arith.constant 0 : i32
    %c0_i32_0 = arith.constant 0 : i32
    %c0_i32_1 = arith.constant 0 : i32
    return %c0_i32, %c0_i32_0 : i32, i32
  }
  func.func @transform_3(%arg0: i32) -> (i32, i32) {
    %c0_i32 = arith.constant 0 : i32
    %c0_i32_0 = arith.constant 0 : i32
    %c0_i32_1 = arith.constant 0 : i32
    return %c0_i32, %c0_i32_0 : i32, i32
  }
  func.func @transform_4(%arg0: i32) -> (i32, i32) {
    %c0_i32 = arith.constant 0 : i32
    %c0_i32_0 = arith.constant 0 : i32
    %c0_i32_1 = arith.constant 0 : i32
    return %c0_i32, %c0_i32_0 : i32, i32
  }
  func.func @transform_5(%arg0: i32) -> (i32, i32) {
    %c0_i32 = arith.constant 0 : i32
    %c0_i32_0 = arith.constant 0 : i32
    %c0_i32_1 = arith.constant 0 : i32
    return %c0_i32, %c0_i32_0 : i32, i32
  }
  func.func @transform_6(%arg0: i32) -> (i32, i32) {
    %c0_i32 = arith.constant 0 : i32
    %c0_i32_0 = arith.constant 0 : i32
    %c0_i32_1 = arith.constant 0 : i32
    return %c0_i32, %c0_i32_0 : i32, i32
  }
  func.func @transform_7(%arg0: i32) -> (i32, i32) {
    %c0_i32 = arith.constant 0 : i32
    %c0_i32_0 = arith.constant 0 : i32
    return %c0_i32, %arg0 : i32, i32
  }
}

</mosaic_0001>

<bundles_post_ra>
// kernel: tpu_custom_call.1
= control target key start
LH: loop header
LB: loop body
LE: loop exit
PB: predicated region body
PF: predicated region fallthrough
CT: control target
= control target key end

     0   :  { %s686_s0 = inlined_call_operand.vmem [shape: f32[128,32], index: 0, kind: input, shape index: {}]   ;;  %s687_s1 = inlined_call_operand.vmem [shape: f32[64,32], index: 1, kind: input, shape index: {}]   ;;  %s688_s2 = inlined_call_operand.vmem [shape: f32[64,1], index: 2, kind: input, shape index: {}]   ;;  %s689_s3 = inlined_call_operand.vmem [shape: f32[32,64], index: 3, kind: input, shape index: {}]   ;;  %s690_s4 = inlined_call_operand.vmem [shape: f32[32,1], index: 4, kind: input, shape index: {}]   ;;  %s691_s5 = inlined_call_operand.vmem [shape: f32[32,1], index: 5, kind: input, shape index: {}]   ;;  %s692_s6 = inlined_call_operand.<no memory space> [shape: f32[1,1], index: 6, kind: input, shape index: {}]   ;;  %s693_s7 = inlined_call_operand.hbm [shape: f32[1,128], index: 7, kind: output, shape index: {}]  }
   0x1   :  { %v12_v0 = vstv %s692_s6 }
   0x2   :  { %13 = vst [vmem:[#allocation2] sm:$0x1] %v12_v0 }
   0x3   :  { %v44_v1 = vld [vmem:[%s686_s0 + $0x78] sm:$0xff]  ;;  %vm101_vm0 = vcmask 261120   ;;  %v43_v2 = vld [vmem:[%s686_s0 + $0x70] sm:$0xff] }
   0x4   :  { %388 = vmatpush.xpose.msk.msra.mxu3 %vm101_vm0, %v44_v1  ;;  %387 = vmatpush.xpose.msk.msra.mxu2 %vm101_vm0, %v44_v1 }
   0x5   :  { %359 = vmatpush.xpose.msk.msra.mxu0 %vm101_vm0, %v44_v1 }
   0x6   :  { %14 = vsyncpa [#allocation4], 0  ;;  %v42_v3 = vld [vmem:[%s686_s0 + $0x68] sm:$0xff]  ;;  %v41_v4 = vld [vmem:[%s686_s0 + $0x60] sm:$0xff]  ;;  %v450_v13 = vmov 0   ;;  %vm251_vm1 = vcmask 523264  }
   0x7   :  { %v40_v5 = vld [vmem:[%s686_s0 + $0x58] sm:$0xff]  ;;  %v39_v6 = vld [vmem:[%s686_s0 + $0x50] sm:$0xff]  ;;  %v38_v7 = vld [vmem:[%s686_s0 + $0x48] sm:$0xff]  ;;  %421 = vset.pattern.permute.xlu0 %v450_v13  ;;  %422 = vset.pattern.permute.xlu1 %v450_v13  ;;  %s350_s15 = sshll.u32 %s693_s7, 4  ;;  %s351_s15 = int_to_ptr.hbm [resolvable:$true] %s350_s15 }
   0x8   :  { %390 = vmatpush.xpose.msk.msra.mxu3 %vm101_vm0, %v43_v2  ;;  %389 = vmatpush.xpose.msk.msra.mxu2 %vm101_vm0, %v43_v2  ;;  %v37_v8 = vld [vmem:[%s686_s0 + $0x40] sm:$0xff]  ;;  %v36_v9 = vld [vmem:[%s686_s0 + $0x38] sm:$0xff]  ;;  %v58_v11 = vld [vmem:[%s688_s2 + $0x28] sm:$0xff] }
   0x9   :  { %360 = vmatpush.xpose.msk.msra.mxu0 %vm101_vm0, %v43_v2  ;;  %v60_v10 = vld [vmem:[%s688_s2 + $0x38] sm:$0xff]  ;;  %v35_v12 = vld [vmem:[%s686_s0 + $0x30] sm:$0xff]  ;;  %88 = vperm.xlu1 %422, %v58_v11   ;;  %v34_v14 = vld [vmem:[%s686_s0 + $0x28] sm:$0xff] }
   0xa   :  { %98 = vperm.xlu0 %421, %v60_v10   ;;  %423 = vset.pattern.permute.xlu2 %v450_v13  ;;  %v59_v15 = vld [vmem:[%s688_s2 + $0x30] sm:$0xff]  ;;  %v57_v16 = vld [vmem:[%s688_s2 + $0x20] sm:$0xff]  ;;  %v32_v18 = vld [vmem:[%s686_s0 + $0x18] sm:$0xff] }
   0xb   :  { %v33_v17 = vld [vmem:[%s686_s0 + $0x20] sm:$0xff]  ;;  %v54_v19 = vld [vmem:[%s688_s2 + $0x8] sm:$0xff]  ;;  %v31_v21 = vld [vmem:[%s686_s0 + $0x10] sm:$0xff] }
   0xc   :  { %392 = vmatpush.xpose.msk.msra.mxu3 %vm101_vm0, %v42_v3  ;;  %391 = vmatpush.xpose.msk.msra.mxu2 %vm101_vm0, %v42_v3  ;;  %v53_v20 = vld [vmem:[%s688_s2] sm:$0xff]  ;;  %v30_v22 = vld [vmem:[%s686_s0 + $0x8] sm:$0xff]  ;;  %v229_v24 = vld [vmem:[%s690_s4 + $0x10] sm:$0xff] }
   0xd   :  { %361 = vmatpush.xpose.msk.msra.mxu0 %vm101_vm0, %v42_v3  ;;  %v228_v23 = vld [vmem:[%s690_s4 + $0x8] sm:$0xff]  ;;  %v29_v25 = vld [vmem:[%s686_s0] sm:$0xff]  ;;  %v48_v26 = vld [vmem:[%s687_s1 + $0x18] sm:$0xff] }
   0xe   :  { %v46_v27 = vld [vmem:[%s687_s1 + $0x8] sm:$0xff]  ;;  %v297_v28 = vld [vmem:[%s691_s5] sm:$0xff]  ;;  %v56_v31 = vld [vmem:[%s688_s2 + $0x18] sm:$0xff] }
   0xf   :  { %v45_v29 = vld [vmem:[%s687_s1] sm:$0xff]  ;;  %v298_v30 = vld [vmem:[%s691_s5 + $0x8] sm:$0xff]  ;;  %78 = vperm.xlu2 %423, %v56_v31   ;;  %v47_v33 = vld [vmem:[%s687_s1 + $0x10] sm:$0xff] }
  0x10   :  { %394 = vmatpush.xpose.msk.msra.mxu3 %vm101_vm0, %v41_v4  ;;  %393 = vmatpush.xpose.msk.msra.mxu2 %vm101_vm0, %v41_v4  ;;  %v49_v32 = vld [vmem:[%s687_s1 + $0x20] sm:$0xff]  ;;  %v55_v34 = vld [vmem:[%s688_s2 + $0x10] sm:$0xff]  ;;  %v300_v35 = vld [vmem:[%s691_s5 + $0x18] sm:$0xff] }
  0x11   :  { %362 = vmatpush.xpose.msk.msra.mxu0 %vm101_vm0, %v41_v4  ;;  %83 = vperm.xlu1 %422, %v57_v16   ;;  %v334_v36 = vld [vmem:[#allocation2] sm:$0x1]  ;;  %v50_v37 = vld [vmem:[%s687_s1 + $0x28] sm:$0xff]  ;;  %v51_v39 = vld [vmem:[%s687_s1 + $0x30] sm:$0xff] }
  0x12   :  { %93 = vperm.xlu0 %421, %v59_v15   ;;  %v227_v38 = vld [vmem:[%s690_s4] sm:$0xff]  ;;  %v230_v40 = vld [vmem:[%s690_s4 + $0x18] sm:$0xff]  ;;  %v299_v42 = vld [vmem:[%s691_s5 + $0x10] sm:$0xff] }
  0x13   :  { %v52_v41 = vld [vmem:[%s687_s1 + $0x38] sm:$0xff]  ;;  %v223_v11 = vld [vmem:[%s689_s3] sm:$0xff]  ;;  %v225_v13 = vld [vmem:[%s689_s3 + $0x10] sm:$0xff] }
  0x14   :  { %396 = vmatpush.xpose.msk.msra.mxu3 %vm101_vm0, %v40_v5  ;;  %395 = vmatpush.xpose.msk.msra.mxu2 %vm101_vm0, %v40_v5 }
  0x15   :  { %363 = vmatpush.xpose.msk.msra.mxu0 %vm101_vm0, %v40_v5 }
  0x17   :  { %73 = vperm.xlu2 %423, %v55_v34  }
  0x18   :  { %398 = vmatpush.xpose.msk.msra.mxu3 %vm101_vm0, %v39_v6  ;;  %397 = vmatpush.xpose.msk.msra.mxu2 %vm101_vm0, %v39_v6 }
  0x19   :  { %364 = vmatpush.xpose.msk.msra.mxu0 %vm101_vm0, %v39_v6  ;;  %63 = vperm.xlu1 %422, %v53_v20  }
  0x1a   :  { %68 = vperm.xlu0 %421, %v54_v19  }
  0x1c   :  { %400 = vmatpush.xpose.msk.msra.mxu3 %vm101_vm0, %v38_v7  ;;  %399 = vmatpush.xpose.msk.msra.mxu2 %vm101_vm0, %v38_v7 }
  0x1d   :  { %365 = vmatpush.xpose.msk.msra.mxu0 %vm101_vm0, %v38_v7 }
  0x1f   :  { %233 = vperm.xlu2 %423, %v227_v38  }
  0x20   :  { %402 = vmatpush.xpose.msk.msra.mxu3 %vm101_vm0, %v37_v8  ;;  %401 = vmatpush.xpose.msk.msra.mxu2 %vm101_vm0, %v37_v8 }
  0x21   :  { %366 = vmatpush.xpose.msk.msra.mxu0 %vm101_vm0, %v37_v8  ;;  %243 = vperm.xlu1 %422, %v229_v24  }
  0x22   :  { %238 = vperm.xlu0 %421, %v228_v23  }
  0x24   :  { %404 = vmatpush.xpose.msk.msra.mxu3 %vm101_vm0, %v36_v9  ;;  %403 = vmatpush.xpose.msk.msra.mxu2 %vm101_vm0, %v36_v9 }
  0x25   :  { %367 = vmatpush.xpose.msk.msra.mxu0 %vm101_vm0, %v36_v9 }
  0x27   :  { %248 = vperm.xlu2 %423, %v230_v40  }
  0x28   :  { %406 = vmatpush.xpose.msk.msra.mxu3 %vm101_vm0, %v35_v12  ;;  %405 = vmatpush.xpose.msk.msra.mxu2 %vm101_vm0, %v35_v12 }
  0x29   :  { %368 = vmatpush.xpose.msk.msra.mxu0 %vm101_vm0, %v35_v12  ;;  %308 = vperm.xlu1 %422, %v298_v30   ;;  %v224_v12 = vld [vmem:[%s689_s3 + $0x8] sm:$0xff] }
  0x2a   :  { %303 = vperm.xlu0 %421, %v297_v28  }
  0x2c   :  { %408 = vmatpush.xpose.msk.msra.mxu3 %vm101_vm0, %v34_v14  ;;  %407 = vmatpush.xpose.msk.msra.mxu2 %vm101_vm0, %v34_v14 }
  0x2d   :  { %369 = vmatpush.xpose.msk.msra.mxu0 %vm101_vm0, %v34_v14  ;;  %v226_v14 = vld [vmem:[%s689_s3 + $0x18] sm:$0xff]  ;;  %s451_s3 = smov [#allocation3]  }
  0x2e   :  { %s348_s12 = sshll.u32 %s451_s3, 4  ;;  %s349_s12 = int_to_ptr.vmem [resolvable:$true] %s348_s12 }
  0x2f   :  { %313 = vperm.xlu2 %423, %v299_v42  }
  0x30   :  { %410 = vmatpush.xpose.msk.msra.mxu3 %vm101_vm0, %v33_v17  ;;  %409 = vmatpush.xpose.msk.msra.mxu2 %vm101_vm0, %v33_v17 }
  0x31   :  { %370 = vmatpush.xpose.msk.msra.mxu0 %vm101_vm0, %v33_v17  ;;  %337 = vperm.xlu1 %422, %v334_v36  }
  0x32   :  { %318 = vperm.xlu0 %421, %v300_v35  }
  0x34   :  { %412 = vmatpush.xpose.msk.msra.mxu3 %vm101_vm0, %v32_v18  ;;  %411 = vmatpush.xpose.msk.msra.mxu2 %vm101_vm0, %v32_v18 }
  0x35   :  { %371 = vmatpush.xpose.msk.msra.mxu0 %vm101_vm0, %v32_v18 }
  0x38   :  { %414 = vmatpush.xpose.msk.msra.mxu3 %vm101_vm0, %v31_v21  ;;  %413 = vmatpush.xpose.msk.msra.mxu2 %vm101_vm0, %v31_v21 }
  0x39   :  { %372 = vmatpush.xpose.msk.msra.mxu0 %vm101_vm0, %v31_v21 }
  0x3c   :  { %416 = vmatpush.xpose.msk.msra.mxu3 %vm101_vm0, %v30_v22  ;;  %415 = vmatpush.xpose.msk.msra.mxu2 %vm101_vm0, %v30_v22 }
  0x3d   :  { %373 = vmatpush.xpose.msk.msra.mxu0 %vm101_vm0, %v30_v22 }
  0x40   :  { %418 = vmatpush.xpose.msk.msra.mxu3 %vm101_vm0, %v29_v25  ;;  %417 = vmatpush.xpose.msk.msra.mxu2 %vm101_vm0, %v29_v25 }
  0x41   :  { %374 = vmatpush.xpose.msk.msra.mxu0 %vm101_vm0, %v29_v25 }
  0x43   :  { %378 = vmatmul.msk.f32.vlgmr.msra.gmra.mxu3 %vm101_vm0, %v48_v26  ;;  %376 = vmatmul.msk.f32.vlgmr.msra.gmra.mxu2 %vm101_vm0, %v46_v27 }
  0x44   :  { %375 = vmatmul.msk.f32.vlgmr.msra.gmra.mxu0 %vm101_vm0, %v45_v29 }
  0x4b   :  { %379 = vmatmul.msk.f32.gmra.mxu3 %vm101_vm0, %v49_v32  ;;  %377 = vmatmul.msk.f32.gmra.mxu2 %vm101_vm0, %v47_v33 }
  0x53   :  { %380 = vmatmul.msk.f32.gmra.mxu3 %vm101_vm0, %v50_v37 }
  0x5b   :  { %381 = vmatmul.msk.f32.gmra.mxu3 %vm101_vm0, %v51_v39 }
  0x63   :  { %382 = vmatmul.msk.f32.gmra.mxu3 %vm101_vm0, %v52_v41 }
  0x69   :  { %v79_v50 = vpop.permute.xlu2 %78 }
  0x71   :  { %v74_v63 = vpop.permute.xlu2 %73 }
  0x79   :  { %v234_v16 = vpop.permute.xlu2 %233 }
  0x7b   :  { %v89_v47 = vpop.permute.xlu1 %88 }
  0x7c   :  { %v99_v46 = vpop.permute.xlu0 %98 }
  0x81   :  { %v249_v20 = vpop.permute.xlu2 %248 }
  0x83   :  { %v84_v55 = vpop.permute.xlu1 %83 }
  0x84   :  { %v94_v51 = vpop.permute.xlu0 %93 }
  0x89   :  { %v314_v31 = vpop.permute.xlu2 %313 }
  0x8b   :  { %v64_v6 = vpop.permute.xlu1 %63 }
  0x8c   :  { %v69_v2 = vpop.permute.xlu0 %68 }
  0x93   :  { %v244_v19 = vpop.permute.xlu1 %243 }
  0x94   :  { %v239_v17 = vpop.permute.xlu0 %238 }
  0x9b   :  { %v309_v29 = vpop.permute.xlu1 %308 }
  0x9c   :  { %v304_v25 = vpop.permute.xlu0 %303 }
  0xa4   :  { %v319_v38 = vpop.permute.xlu0 %318 }
  0xc1   :  { %v191_v3 = vpop.f32.mrf.mxu0 }
  0xc2   :  { %v192_v7 = vadd.f32 %v191_v3, %v64_v6 }
  0xc4   :  { %v215_v10 = vmax.f32 %v192_v7, 0.0 }
  0xc6   :  { %v200_v43 = vpop.f32.mrf.mxu3  ;;  %v194_v49 = vpop.f32.mrf.mxu2 }
  0xc7   :  { %v201_v61 = vadd.f32 %v200_v43, %v79_v50  ;;  %v195_v5 = vadd.f32 %v194_v49, %v69_v2 }
  0xc9   :  { %v218_v4 = vmax.f32 %v201_v61, 0.0  ;;  %v216_v9 = vmax.f32 %v195_v5, 0.0 }
  0xce   :  { %v203_v44 = vpop.f32.mrf.mxu3  ;;  %v197_v60 = vpop.f32.mrf.mxu2 }
  0xcf   :  { %v204_v58 = vadd.f32 %v203_v44, %v84_v55  ;;  %v198_v1 = vadd.f32 %v197_v60, %v74_v63 }
  0xd1   :  { %v219_v0 = vmax.f32 %v204_v58, 0.0  ;;  %v217_v8 = vmax.f32 %v198_v1, 0.0 }
  0xd6   :  { %v206_v45 = vpop.f32.mrf.mxu3 }
  0xd7   :  { %v207_v56 = vadd.f32 %v206_v45, %v89_v47 }
  0xd9   :  { %v220_v62 = vmax.f32 %v207_v56, 0.0 }
  0xde   :  { %v209_v48 = vpop.f32.mrf.mxu3 }
  0xdf   :  { %v210_v53 = vadd.f32 %v209_v48, %v94_v51 }
  0xe1   :  { %v221_v59 = vmax.f32 %v210_v53, 0.0 }
  0xe6   :  { %v212_v52 = vpop.f32.mrf.mxu3 }
  0xe7   :  { %v213_v54 = vadd.f32 %v212_v52, %v99_v46  ;;  %v338_v46 = vpop.permute.xlu1 %337 }
  0xe8   :  { %v340_v48 = vperm.slane %v338_v46, 0 }
  0xe9   :  { %v222_v57 = vmax.f32 %v213_v54, 0.0 }
  0xeb   :  { %272 = vmatpush.msra.mxu1 %v222_v57 }
  0xed   :  { %273 = vmatpush.msra.mxu1 %v221_v59 }
  0xef   :  { %274 = vmatpush.msra.mxu1 %v220_v62 }
  0xf1   :  { %275 = vmatpush.msra.mxu1 %v219_v0 }
  0xf3   :  { %276 = vmatpush.msra.mxu1 %v218_v4 }
  0xf5   :  { %277 = vmatpush.msra.mxu1 %v217_v8 }
  0xf7   :  { %278 = vmatpush.msra.mxu1 %v216_v9 }
  0xf9   :  { %279 = vmatpush.msra.mxu1 %v215_v10 }
  0xfa   :  { %383 = vmatmul.msk.f32.vlgmr.msra.gmra.mxu1 %vm251_vm1, %v223_v11 }
 0x102   :  { %384 = vmatmul.msk.f32.gmra.mxu1 %vm251_vm1, %v224_v12 }
 0x10a   :  { %385 = vmatmul.msk.f32.gmra.mxu1 %vm251_vm1, %v225_v13 }
 0x112   :  { %386 = vmatmul.msk.f32.gmra.mxu1 %vm251_vm1, %v226_v14 }
 0x177   :  { %v281_v15 = vpop.f32.mrf.mxu1 }
 0x178   :  { %v282_v23 = vadd.f32 %v281_v15, %v234_v16 }
 0x17a   :  { %v293_v27 = vmax.f32 %v282_v23, 0.0 }
 0x17c   :  { %v321_v33 = vmul.f32 %v304_v25, %v293_v27 }
 0x17f   :  { %v284_v18 = vpop.f32.mrf.mxu1 }
 0x180   :  { %v285_v21 = vadd.f32 %v284_v18, %v239_v17 }
 0x182   :  { %v294_v26 = vmax.f32 %v285_v21, 0.0 }
 0x184   :  { %v322_v30 = vmul.f32 %v309_v29, %v294_v26 }
 0x186   :  { %v325_v36 = vadd.f32 %v322_v30, %v321_v33 }
 0x187   :  { %v287_v22 = vpop.f32.mrf.mxu1 }
 0x188   :  { %v288_v24 = vadd.f32 %v287_v22, %v244_v19 }
 0x18a   :  { %v295_v28 = vmax.f32 %v288_v24, 0.0 }
 0x18c   :  { %v323_v34 = vmul.f32 %v314_v31, %v295_v28 }
 0x18e   :  { %v326_v39 = vadd.f32 %v325_v36, %v323_v34 }
 0x18f   :  { %v290_v32 = vpop.f32.mrf.mxu1 }
 0x190   :  { %v291_v35 = vadd.f32 %v290_v32, %v249_v20 }
 0x192   :  { %v296_v37 = vmax.f32 %v291_v35, 0.0 }
 0x194   :  { %v324_v40 = vmul.f32 %v319_v38, %v296_v37 }
 0x196   :  { %v327_v41 = vadd.f32 %v326_v39, %v324_v40 }
 0x198   :  { %v328_v42 = vrot.slane %v327_v41, 4 }
 0x19a   :  { %v329_v43 = vadd.f32 %v328_v42, %v327_v41 }
 0x19c   :  { %v330_v44 = vrot.slane %v329_v43, 2 }
 0x19e   :  { %v331_v45 = vadd.f32 %v330_v44, %v329_v43 }
 0x1a0   :  { %v332_v47 = vrot.slane %v331_v45, 1 }
 0x1a2   :  { %v333_v49 = vadd.f32 %v332_v47, %v331_v45 }
 0x1a4   :  { %v341_v50 = vadd.f32 %v340_v48, %v333_v49 }
 0x1a6   :  { %342 = vst [vmem:[#allocation3] sm:$0x1] %v341_v50 }
 0x1a7   :  { %353 = dma.vmem_to_hbm [thread:$0]  %s349_s12, 16, %s351_s15, [#allocation4]  }
 0x1a8   :  { %448 = dma.done.wait [#allocation4], 16  }
 0x1a9   :  { %449 = vsyncadd [#allocation4], 4294967280 }
 0x1aa   :  { %358 = vsyncpa [#allocation4], 1 }

</bundles_post_ra>
